<compile_context>
chip_gen: v6e
topology: v6e:2x2x1
jax: 0.10.0
libtpu: 0.0.40
codegen_flags: <defaults>
</compile_context>

<pallas_src>
import functools

import jax
import jax.numpy as jnp
from jax.experimental import pallas as pl
from jax.experimental.pallas import tpu as pltpu


def _conv1x1_kernel(x_ref, w_ref, b_ref, o_ref):
    # x_ref: (Cin, T)   w_ref: (Cout, Cin)   b_ref: (Cout, 1)   o_ref: (Cout, T)
    acc = jnp.dot(w_ref[...], x_ref[...], preferred_element_type=jnp.float32)
    o_ref[...] = (acc + b_ref[...]).astype(o_ref.dtype)


def _round_up(x, m):
    return ((x + m - 1) // m) * m


@functools.lru_cache(maxsize=None)
def _vmem_plan():
    """Return (per-stage block byte budget, vmem_limit_bytes) for this chip.

    v5e/v6e: 128 MiB VMEM -> limit ~96 MiB, ~24 MiB per-stage (x+out) blocks.
    v7x:      64 MiB VMEM -> limit ~48 MiB, ~12 MiB per-stage (x+out) blocks.
    Fallback (query unavailable) uses the v7x-safe numbers.
    """
    vmem_cap = 64 * 1024 * 1024  # conservative default: v7x per-TensorCore VMEM
    try:
        cap = getattr(pltpu.get_tpu_info(), "vmem_capacity_bytes", None)
        if cap:
            vmem_cap = int(cap)
    except Exception:
        pass
    vmem_limit = (3 * vmem_cap) // 4   # ~25% headroom below physical VMEM
    per_stage = vmem_limit // 4        # double-buffered (x + out) blocks + slack
    return per_stage, vmem_limit


@jax.jit
def out_conv(x_nchw, weight, bias):
    """nn.Conv2d(in_c, out_c, kernel_size=1) forward pass. NCHW in / NCHW out.

    x_nchw: (N, Cin, H, W)
    weight: (Cout, Cin, 1, 1)  (PyTorch layout)
    bias:   (Cout,)
    returns (N, Cout, H, W) with the input dtype.
    """
    N, Cin, H, W = x_nchw.shape
    Cout = weight.shape[0]
    HW = H * W

    # Free reshapes (contiguous) -- no transposes, no padding copies.
    x_flat = x_nchw.reshape(N, Cin, HW)      # (N, Cin, HW), spatial on lanes
    w_mat = weight.reshape(Cout, Cin)        # (Cout, Cin)
    b_col = bias.reshape(Cout, 1)            # broadcasts over lanes

    # Spatial tile: as many 128-lane groups as the per-stage VMEM budget allows,
    # capped at the (128-rounded) full spatial extent.
    per_stage, vmem_limit = _vmem_plan()
    itemsize = jnp.dtype(x_nchw.dtype).itemsize
    bytes_per_pos = (Cin + Cout) * itemsize
    cap_lanes = max(128, ((per_stage // bytes_per_pos) // 128) * 128)
    tile_hw = min(cap_lanes, _round_up(HW, 128))

    # Keep at least 2 total grid steps so both v7x TensorCores get work.
    num_blk = -(-HW // tile_hw)
    if N * num_blk < 2 and HW > 128:
        tile_hw = max(128, _round_up(-(-HW // 2), 128))
        num_blk = -(-HW // tile_hw)

    grid = (N, num_blk)  # ragged last spatial block is masked by Pallas

    out_flat = pl.pallas_call(
        _conv1x1_kernel,
        out_shape=jax.ShapeDtypeStruct((N, Cout, HW), x_nchw.dtype),
        grid_spec=pltpu.PrefetchScalarGridSpec(
            num_scalar_prefetch=0,
            grid=grid,
            in_specs=[
                # x: Cin on sublanes (full dim), spatial on lanes (lane-dense loads)
                pl.BlockSpec((pl.Squeezed(), Cin, tile_hw), lambda n, j: (n, 0, j)),
                # weight: tiny, constant index_map -> resident across the grid
                pl.BlockSpec((Cout, Cin), lambda n, j: (0, 0)),
                # bias: tiny column vector, resident, broadcasts over lanes
                pl.BlockSpec((Cout, 1), lambda n, j: (0, 0)),
            ],
            # output: Cout on sublanes, spatial on lanes (lane-dense stores)
            out_specs=pl.BlockSpec((pl.Squeezed(), Cout, tile_hw), lambda n, j: (n, 0, j)),
        ),
        compiler_params=pltpu.CompilerParams(
            dimension_semantics=("parallel", "parallel"),
            vmem_limit_bytes=vmem_limit,
        ),
    )(x_flat, w_mat, b_col)

    return out_flat.reshape(N, Cout, H, W)


def init_out_conv_params(key, in_channels, out_channels, dtype=jnp.float32):
    """Deterministic init mimicking PyTorch Conv2d defaults (uniform +/- 1/sqrt(fan_in))."""
    kw, kb = jax.random.split(key)
    fan_in = in_channels * 1 * 1
    bound = 1.0 / (fan_in ** 0.5)
    weight = jax.random.uniform(
        kw, (out_channels, in_channels, 1, 1), dtype, minval=-bound, maxval=bound
    )
    bias = jax.random.uniform(kb, (out_channels,), dtype, minval=-bound, maxval=bound)
    return weight, bias


if __name__ == "__main__":
    key = jax.random.PRNGKey(0)
    k_x, k_p = jax.random.split(key)

    N, Cin, Hs, Ws = 2, 4, 16, 16
    Cout = 3

    x = jax.random.normal(k_x, (N, Cin, Hs, Ws), jnp.float32)
    weight, bias = init_out_conv_params(k_p, Cin, Cout)

    y = jax.block_until_ready(out_conv(x, weight, bias))

    # Reference check (pure JAX einsum of the same 1x1 conv)
    y_ref = (
        jnp.einsum("nchw,oc->nohw", x, weight.reshape(Cout, Cin))
        + bias.reshape(1, Cout, 1, 1)
    )
    assert y.shape == (N, Cout, Hs, Ws)
    assert jnp.allclose(y, y_ref, atol=1e-5, rtol=1e-5)

    print("KERNEL_OK")
</pallas_src>

<mosaic_0001>
module attributes {stable_mosaic.version = 11 : i64} {
  func.func @_conv1x1_kernel(%arg0: i32, %arg1: i32, %arg2: memref<1x4x256xf32, #tpu.memory_space<vmem>>, %arg3: memref<3x4xf32, #tpu.memory_space<vmem>>, %arg4: memref<3x1xf32, #tpu.memory_space<vmem>>, %arg5: memref<1x3x256xf32, #tpu.memory_space<vmem>>) attributes {dimension_semantics = [#tpu.dimension_semantics<parallel>, #tpu.dimension_semantics<parallel>], iteration_bounds = array<i64: 2, 1>, scalar_prefetch = 0 : i64, scratch_operands = 0 : i64, tpu.core_type = #tpu.core_type<tc>, window_params = [{transform_indices = @transform_0, window_bounds = array<i64: 1, 4, 256>}, {pipeline_mode = #tpu.pipeline_mode<synchronous>, transform_indices = @transform_1, window_bounds = array<i64: 3, 4>}, {pipeline_mode = #tpu.pipeline_mode<synchronous>, transform_indices = @transform_2, window_bounds = array<i64: 3, 1>}, {transform_indices = @transform_3, window_bounds = array<i64: 1, 3, 256>}]} {
    %c0 = arith.constant 0 : index
    %c0_0 = arith.constant 0 : index
    %0 = vector.load %arg3[%c0, %c0_0] : memref<3x4xf32, #tpu.memory_space<vmem>>, vector<3x4xf32>
    %c0_1 = arith.constant 0 : index
    %c0_2 = arith.constant 0 : index
    %c0_3 = arith.constant 0 : index
    %1 = vector.load %arg2[%c0_1, %c0_2, %c0_3] : memref<1x4x256xf32, #tpu.memory_space<vmem>>, vector<1x4x256xf32>
    %2 = vector.shape_cast %1 : vector<1x4x256xf32> to vector<4x256xf32>
    %cst = arith.constant dense<0.000000e+00> : vector<3x256xf32>
    %3 = tpu.matmul %0, %2, %cst {dimension_numbers = #tpu.dot_dimension_numbers<[1], [0], [0], [1], [0, 0, 1, 1], [], []>} : vector<3x4xf32>, vector<4x256xf32>, vector<3x256xf32> -> vector<3x256xf32>
    %c0_4 = arith.constant 0 : index
    %c0_5 = arith.constant 0 : index
    %4 = vector.load %arg4[%c0_4, %c0_5] : memref<3x1xf32, #tpu.memory_space<vmem>>, vector<3x1xf32>
    %5 = vector.broadcast %4 : vector<3x1xf32> to vector<3x256xf32>
    %6 = arith.addf %3, %5 : vector<3x256xf32>
    %c0_6 = arith.constant 0 : index
    %c0_7 = arith.constant 0 : index
    %c0_8 = arith.constant 0 : index
    %7 = vector.load %arg5[%c0_6, %c0_7, %c0_8] : memref<1x3x256xf32, #tpu.memory_space<vmem>>, vector<1x3x256xf32>
    %8 = vector.shape_cast %7 : vector<1x3x256xf32> to vector<3x256xf32>
    %9 = vector.shape_cast %6 : vector<3x256xf32> to vector<1x3x256xf32>
    tpu.vector_store %arg5[%c0_6, %c0_7, %c0_8], %9 {strides = array<i32>} : memref<1x3x256xf32, #tpu.memory_space<vmem>>, vector<1x3x256xf32>,
    return
  }
  func.func @transform_0(%arg0: i32, %arg1: i32) -> (i32, i32, i32) {
    %c0_i32 = arith.constant 0 : i32
    %c0_i32_0 = arith.constant 0 : i32
    return %arg0, %c0_i32, %arg1 : i32, i32, i32
  }
  func.func @transform_1(%arg0: i32, %arg1: i32) -> (i32, i32) {
    %c0_i32 = arith.constant 0 : i32
    %c0_i32_0 = arith.constant 0 : i32
    %c0_i32_1 = arith.constant 0 : i32
    return %c0_i32, %c0_i32_0 : i32, i32
  }
  func.func @transform_2(%arg0: i32, %arg1: i32) -> (i32, i32) {
    %c0_i32 = arith.constant 0 : i32
    %c0_i32_0 = arith.constant 0 : i32
    %c0_i32_1 = arith.constant 0 : i32
    return %c0_i32, %c0_i32_0 : i32, i32
  }
  func.func @transform_3(%arg0: i32, %arg1: i32) -> (i32, i32, i32) {
    %c0_i32 = arith.constant 0 : i32
    %c0_i32_0 = arith.constant 0 : i32
    return %arg0, %c0_i32, %arg1 : i32, i32, i32
  }
}

</mosaic_0001>

<bundles_post_ra>
// kernel: out_conv.1
= control target key start
LH: loop header
LB: loop body
LE: loop exit
PB: predicated region body
PF: predicated region fallthrough
CT: control target
= control target key end

     0   :  { %s482_s12 = smov 0   ;;  %s484_s13 = smov 0   ;;  %s521_s0 = inlined_call_operand.vmem [shape: f32[2,4,256], index: 0, kind: input, shape index: {}]   ;;  %s522_s1 = inlined_call_operand.vmem [shape: f32[3,4], index: 1, kind: input, shape index: {}]   ;;  %s523_s2 = inlined_call_operand.vmem [shape: f32[3,1], index: 2, kind: input, shape index: {}]   ;;  %s524_s3 = inlined_call_operand.vmem [shape: f32[2,3,256], index: 3, kind: output, shape index: {}]  }
   0x1   :  { %s486_s14 = smov 0  }
   0x2 LB: > { %s25_s15 = sadd.s32 1, %s454_s13  ;;  %p396_p0 = scmp.ge.s32.totalorder %s458_s14, 1  ;;  %s458_s14 = sphi %s486_s14, %s13_s14   ;;  %s454_s13 = sphi %s484_s13, %s526_s13   ;;  %s450_s12 = sphi %s482_s12, %s525_s12  }
   0x3   : > { %p27_p1 = scmp.ge.s32.totalorder %s25_s15, 2  ;;  %p158_p2 = scmp.lt.s32.totalorder %s458_s14, 3 }
   0x5   : > { %s528_s15 = smov (%p27_p1, %s25_s15), 0  ;;  %p159_p3 = pnand %p396_p0, %p158_p2 }
   0x6   : > { %p191_p4 = scmp.lt.s32.totalorder (!%p159_p3), %s450_s12, 1 }
   0x7   : > { %162 = sbr.rel (%p159_p3) target bundleno = 220 (0xdc), region = 32 }
   0xc   : > { %v460_v0 = vmov 0.0   ;;  %v212_v1 = vld [vmem:[%s523_s2] sm:$0x7]  ;;  %s530_s12 = smov (!%p191_p4, %s450_s12), 1  ;;  %v461_v2 = vmov 0   ;;  %vm224_vm0 = vcmask 1043456  }
   0xd   : > { %293 = vmatprep.mubr.f32.mxu0 %v460_v0  ;;  %434 = vset.pattern.permute.xlu0 %v461_v2  ;;  %s406_s18 = sshll.u32 %s530_s12, 3  ;;  %v210_v5 = vld [vmem:[%s522_s1] sm:$0x7]  ;;  %vm220_vm1 = vcmask 31744  }
   0xe   : > { %215 = vperm.xlu0 %434, %v212_v1   ;;  %s198_s21 = scalar_lea.vmem %s521_s0, %s406_s18  ;;  %s208_s26 = scalar_lea.vmem %s524_s3, %s406_s18 }
   0xf   : > { %v211_v3 = vld [vmem:[%s198_s21] sm:$0xff] }
  0x10   : > { %v219_v4 = vcombine.high %v211_v3, %v211_v3 }
  0x12   : > { %401 = vmatprep.subr.msk.mxu0 %vm224_vm0, %v219_v4 }
  0x13   : > { %402 = vmatpush1.msk.msra.mxu0 %vm224_vm0, %v211_v3 }
  0x14   : > { %403 = vmatmul.mubr.msk.f32.vlgmr.msra.gmra.mxu0 %vm220_vm1, %v210_v5 }
  0x89   : > { %v216_v6 = vpop.permute.xlu0 %215 }
  0xd4   : > { %v295_v7 = vpop.f32.mrf.mxu0 }
  0xd5   : > { %v296_v9 = vadd.f32 %v295_v7, %v216_v6 }
  0xd6   : > { %v297_v8 = vpop.f32.mrf.mxu0 }
  0xd7   : > { %v298_v10 = vadd.f32 %v297_v8, %v216_v6 }
  0xd9   : > { %v302_v11 = vcombine.low %v296_v9, %v298_v10 }
  0xdb   : > { %304 = vst [vmem:[%s208_s26] sm:$0x77] %v302_v11 }
  0xdc PF: > { %s13_s14 = sadd.s32 1, %s458_s14   ;;  %s525_s12 = smov %s454_s13 }
  0xdd   : > { %p10_p5 = scmp.ge.s32.totalorder %s13_s14, 4   ;;  %s526_s13 = smov %s528_s15 }
  0xdf   :  { %12 = sbr.rel (!%p10_p5) target bundleno = 2 (0x2), region = 62 }

</bundles_post_ra>
